<compile_context>
chip_gen: v7x
topology: tpu7x:2x2x1
jax: 0.10.0
libtpu: 0.0.40
codegen_flags: <defaults>
</compile_context>

<pallas_src>
import math
import jax
import jax.numpy as jnp
from jax import lax
from jax.experimental import pallas as pl
from jax.experimental.pallas import tpu as pltpu


def _round_up(x, m):
    return ((x + m - 1) // m) * m


def lin_tasc_kernel(w_ref, emb_ref, out_ref):
    # w_ref: (1, TM) f32   emb_ref: (TM, D)   out_ref: (1, TM)
    emb = emb_ref[...]
    ones = jnp.ones((1, emb.shape[1]), dtype=emb.dtype)
    # Row-sum over D on the MXU: (1, D) . (TM, D)^T -> (1, TM), lane-major,
    # f32 accumulation (avoids the XLU sublane->lane relayout of a VPU reduce).
    row_sum = lax.dot_general(
        ones, emb,
        dimension_numbers=(((1,), (1,)), ((), ())),
        preferred_element_type=jnp.float32,
    )
    out_ref[...] = (w_ref[...].astype(jnp.float32) * row_sum).astype(out_ref.dtype)


def _vmem_plan():
    """Generation-aware (vmem_limit_bytes, per-buffer tile byte target)."""
    try:
        phys = int(pltpu.get_tpu_info().vmem_capacity_bytes)
    except Exception:
        phys = 64 << 20                      # conservative: v7x per-TC VMEM
    # Request a scoped limit well under physical VMEM (v7x: 64 MiB phys -> 48 MiB;
    # v5e/v6e: 128 MiB phys -> 56 MiB).
    vmem_limit = int(max(32 << 20, min(phys - (16 << 20), 56 << 20)))
    # The double-buffered emb slab dominates VMEM; keep 2*tile at ~3/4 of limit.
    target_tile_bytes = (vmem_limit * 3) // 8
    return vmem_limit, target_tile_bytes


def _choose_block_rows(M, D, itemsize, target_tile_bytes):
    """Largest lane-dense row tile whose (lane-padded) emb slab fits the budget."""
    # Account for lane padding: each VMEM row occupies round_up(D, 128) lanes.
    row_bytes = max(1, _round_up(D, 128) * itemsize)
    rows = (target_tile_bytes // row_bytes) // 128 * 128
    if rows == 0:
        # Very large D: smallest sublane-aligned tile (rare path).
        rows = max(8, (target_tile_bytes // row_bytes) // 8 * 8)
    rows = min(rows, _round_up(M, 128))      # never wider than the padded problem
    return int(max(rows, 8))


def lin_tasc_forward(input_ids, u_param, embeddings, *, block_rows=None):
    B, S = input_ids.shape
    D = embeddings.shape[-1]
    emb_dtype = embeddings.dtype
    out_dtype = jnp.promote_types(u_param.dtype, emb_dtype)

    # Cheap per-token weight gather by XLA outside the kernel; keep f32 precision.
    w = u_param[input_ids].astype(jnp.float32)          # (B, S)

    M = B * S
    vmem_limit, target_tile_bytes = _vmem_plan()
    if block_rows is None:
        block_rows = _choose_block_rows(
            M, D, jnp.dtype(emb_dtype).itemsize, target_tile_bytes)
    G = pl.cdiv(M, block_rows)
    Mp = G * block_rows

    emb_flat = embeddings.reshape(M, D)
    w_flat = w.reshape(M)
    if Mp != M:
        # Only the tiny weight vector is padded (zeros).
        w_flat = jnp.pad(w_flat, (0, Mp - M))
    if M < block_rows:
        # Tiny problem: a single block would exceed the array -- pad (negligible).
        emb_flat = jnp.pad(emb_flat, ((0, Mp - M), (0, 0)))
    # else: the last block may be clipped; its OOB emb rows are undefined but the
    # corresponding outputs are discarded by the [:M] slice below (w there is 0).
    w2d = w_flat.reshape(G, block_rows)

    def build(sem):
        return pl.pallas_call(
            lin_tasc_kernel,
            out_shape=jax.ShapeDtypeStruct((G, block_rows), out_dtype),
            grid_spec=pltpu.PrefetchScalarGridSpec(
                num_scalar_prefetch=0,
                grid=(G,),
                in_specs=[
                    pl.BlockSpec((1, block_rows), lambda g: (g, 0)),   # tasc weights
                    pl.BlockSpec((block_rows, D), lambda g: (g, 0)),   # emb slab
                ],
                out_specs=pl.BlockSpec((1, block_rows), lambda g: (g, 0)),
            ),
            compiler_params=pltpu.CompilerParams(
                dimension_semantics=(sem,),
                vmem_limit_bytes=vmem_limit,
            ),
        )

    # Shard row tiles across both v7x TensorCores when there is more than one
    # tile; fall back to plain "parallel" on toolchains/chips that reject it.
    try:
        sem = pltpu.CORE_PARALLEL if G > 1 else "parallel"
        out2d = build(sem)(w2d, emb_flat)
    except Exception:
        out2d = build("parallel")(w2d, emb_flat)

    return out2d.reshape(Mp)[:M].reshape(B, S)


if __name__ == "__main__":
    # Small synthetic shapes consistent with the module's forward.
    B, S, D, V = 2, 8, 32, 64

    key = jax.random.PRNGKey(0)
    k_u, k_ids, k_emb = jax.random.split(key, 3)

    # Deterministic parameter init mirroring nn.Parameter(randn(V)).uniform_(-stdv, stdv).
    stdv = 1.0 / math.sqrt(V)
    u_param = jax.random.uniform(k_u, (V,), dtype=jnp.float32,
                                 minval=-stdv, maxval=stdv)

    input_ids = jax.random.randint(k_ids, (B, S), 0, V, dtype=jnp.int32)
    embeddings = jax.random.normal(k_emb, (B, S, D), dtype=jnp.float32)

    out = lin_tasc_forward(input_ids, u_param, embeddings)
    out = jax.block_until_ready(out)

    # Reference check (plain JAX) for correctness.
    ref = (u_param[input_ids][..., None] * embeddings).sum(-1)
    assert out.shape == (B, S)
    assert jnp.allclose(out, ref, atol=1e-5, rtol=1e-5)

    print("KERNEL_OK")
</pallas_src>

<mosaic_0001>
module attributes {stable_mosaic.version = 11 : i64} {
  func.func @lin_tasc_kernel(%arg0: i32, %arg1: memref<1x128xf32, #tpu.memory_space<vmem>>, %arg2: memref<128x32xf32, #tpu.memory_space<vmem>>, %arg3: memref<1x128xf32, #tpu.memory_space<vmem>>) attributes {dimension_semantics = [#tpu.dimension_semantics<parallel>], iteration_bounds = array<i64: 1>, scalar_prefetch = 0 : i64, scratch_operands = 0 : i64, tpu.core_type = #tpu.core_type<tc>, window_params = [{transform_indices = @transform_0, window_bounds = array<i64: 1, 128>}, {transform_indices = @transform_1, window_bounds = array<i64: 128, 32>}, {transform_indices = @transform_2, window_bounds = array<i64: 1, 128>}]} {
    %c0 = arith.constant 0 : index
    %c0_0 = arith.constant 0 : index
    %0 = vector.load %arg2[%c0, %c0_0] : memref<128x32xf32, #tpu.memory_space<vmem>>, vector<128x32xf32>
    %cst = arith.constant 1.000000e+00 : f32
    %1 = vector.broadcast %cst : f32 to vector<1x32xf32>
    %cst_1 = arith.constant dense<0.000000e+00> : vector<1x128xf32>
    %2 = tpu.matmul %1, %0, %cst_1 {dimension_numbers = #tpu.dot_dimension_numbers<[1], [1], [0], [0], [0, 0, 1, 0], [], []>} : vector<1x32xf32>, vector<128x32xf32>, vector<1x128xf32> -> vector<1x128xf32>
    %c0_2 = arith.constant 0 : index
    %c0_3 = arith.constant 0 : index
    %3 = vector.load %arg1[%c0_2, %c0_3] : memref<1x128xf32, #tpu.memory_space<vmem>>, vector<1x128xf32>
    %4 = arith.mulf %3, %2 : vector<1x128xf32>
    %c0_4 = arith.constant 0 : index
    %c0_5 = arith.constant 0 : index
    %5 = vector.load %arg3[%c0_4, %c0_5] : memref<1x128xf32, #tpu.memory_space<vmem>>, vector<1x128xf32>
    tpu.vector_store %arg3[%c0_4, %c0_5], %4 {strides = array<i32>} : memref<1x128xf32, #tpu.memory_space<vmem>>, vector<1x128xf32>,
    return
  }
  func.func @transform_0(%arg0: i32) -> (i32, i32) {
    %c0_i32 = arith.constant 0 : i32
    %c0_i32_0 = arith.constant 0 : i32
    return %arg0, %c0_i32 : i32, i32
  }
  func.func @transform_1(%arg0: i32) -> (i32, i32) {
    %c0_i32 = arith.constant 0 : i32
    %c0_i32_0 = arith.constant 0 : i32
    return %arg0, %c0_i32 : i32, i32
  }
  func.func @transform_2(%arg0: i32) -> (i32, i32) {
    %c0_i32 = arith.constant 0 : i32
    %c0_i32_0 = arith.constant 0 : i32
    return %arg0, %c0_i32 : i32, i32
  }
}

module attributes {stable_mosaic.version = 11 : i64} {
  func.func @lin_tasc_kernel(%arg0: i32, %arg1: memref<1x128xf32, #tpu.memory_space<vmem>>, %arg2: memref<128x32xf32, #tpu.memory_space<vmem>>, %arg3: memref<1x128xf32, #tpu.memory_space<vmem>>) attributes {dimension_semantics = [#tpu.dimension_semantics<parallel>], iteration_bounds = array<i64: 1>, scalar_prefetch = 0 : i64, scratch_operands = 0 : i64, tpu.core_type = #tpu.core_type<tc>, window_params = [{transform_indices = @transform_0, window_bounds = array<i64: 1, 128>}, {transform_indices = @transform_1, window_bounds = array<i64: 128, 32>}, {transform_indices = @transform_2, window_bounds = array<i64: 1, 128>}]} {
    %c0 = arith.constant 0 : index
    %c0_0 = arith.constant 0 : index
    %0 = vector.load %arg2[%c0, %c0_0] : memref<128x32xf32, #tpu.memory_space<vmem>>, vector<128x32xf32>
    %cst = arith.constant 1.000000e+00 : f32
    %1 = vector.broadcast %cst : f32 to vector<1x32xf32>
    %cst_1 = arith.constant dense<0.000000e+00> : vector<1x128xf32>
    %2 = tpu.matmul %1, %0, %cst_1 {dimension_numbers = #tpu.dot_dimension_numbers<[1], [1], [0], [0], [0, 0, 1, 0], [], []>} : vector<1x32xf32>, vector<128x32xf32>, vector<1x128xf32> -> vector<1x128xf32>
    %c0_2 = arith.constant 0 : index
    %c0_3 = arith.constant 0 : index
    %3 = vector.load %arg1[%c0_2, %c0_3] : memref<1x128xf32, #tpu.memory_space<vmem>>, vector<1x128xf32>
    %4 = arith.mulf %3, %2 : vector<1x128xf32>
    %c0_4 = arith.constant 0 : index
    %c0_5 = arith.constant 0 : index
    %5 = vector.load %arg3[%c0_4, %c0_5] : memref<1x128xf32, #tpu.memory_space<vmem>>, vector<1x128xf32>
    tpu.vector_store %arg3[%c0_4, %c0_5], %4 {strides = array<i32>} : memref<1x128xf32, #tpu.memory_space<vmem>>, vector<1x128xf32>,
    return
  }
  func.func @transform_0(%arg0: i32) -> (i32, i32) {
    %c0_i32 = arith.constant 0 : i32
    %c0_i32_0 = arith.constant 0 : i32
    return %arg0, %c0_i32 : i32, i32
  }
  func.func @transform_1(%arg0: i32) -> (i32, i32) {
    %c0_i32 = arith.constant 0 : i32
    %c0_i32_0 = arith.constant 0 : i32
    return %arg0, %c0_i32 : i32, i32
  }
  func.func @transform_2(%arg0: i32) -> (i32, i32) {
    %c0_i32 = arith.constant 0 : i32
    %c0_i32_0 = arith.constant 0 : i32
    return %arg0, %c0_i32 : i32, i32
  }
}

</mosaic_0001>

<bundles_post_ra>
// kernel: tpu_custom_call.1
= control target key start
LH: loop header
LB: loop body
LE: loop exit
PB: predicated region body
PF: predicated region fallthrough
CT: control target
= control target key end

     0   :  { %vm28_vm0 = vcmask 261120   ;;  %v297_v2 = vmov 0.0|0.0   ;;  %vm298_vm2 = vmmov 0   ;;  %v299_v5 = vmov 0.0   ;;  %s403_s0 = inlined_call_operand.vmem [shape: f32[1,128], index: 0, kind: input, shape index: {}]   ;;  %s404_s1 = inlined_call_operand.vmem [shape: f32[128,32], index: 1, kind: input, shape index: {}]   ;;  %s405_s2 = inlined_call_operand.hbm [shape: f32[1,128], index: 2, kind: output, shape index: {}]  }
   0x1   :  { %v12_v0 = vld [vmem:[%s404_s1] sm:$0xff]  ;;  %v13_v1 = vld [vmem:[%s404_s1 + $0x8] sm:$0xff]  ;;  %236 = vmatprep.subr.bf16.mxu0 %v297_v2  ;;  %vm325_vm1 = vmpackc.low %vm28_vm0, %vm28_vm0  ;;  %233 = vmatprep.mubr.msk.f32.mxu0 %vm298_vm2, %v299_v5 }
   0x2   :  { %v237_v3 = vpack.c.bf16 %v13_v1, %v12_v0  ;;  %v14_v6 = vld [vmem:[%s404_s1 + $0x10] sm:$0xff]  ;;  %v15_v7 = vld [vmem:[%s404_s1 + $0x18] sm:$0xff] }
   0x4   :  { %239 = vmatpush3.bf16.xpose.msk.msra.mxu0 %vm325_vm1, %v237_v3 }
   0x5   :  { %240 = vmatprep.subr.bf16.mxu0 %v297_v2 }
   0x6   :  { %7 = vsyncpa [#allocation3], 0  ;;  %v241_v8 = vpack.c.bf16 %v15_v7, %v14_v6  ;;  %v16_v9 = vld [vmem:[%s404_s1 + $0x20] sm:$0xff]  ;;  %v17_v10 = vld [vmem:[%s404_s1 + $0x28] sm:$0xff]  ;;  %v300_v27 = vmov 1.0   ;;  %s301_s15 = smov [#allocation2]  }
   0x7   :  { %v245_v11 = vpack.c.bf16 %v17_v10, %v16_v9  ;;  %v18_v12 = vld [vmem:[%s404_s1 + $0x30] sm:$0xff]  ;;  %v19_v13 = vld [vmem:[%s404_s1 + $0x38] sm:$0xff]  ;;  %v20_v15 = vld [vmem:[%s404_s1 + $0x40] sm:$0xff]  ;;  %s159_s16 = sshll.u32 %s301_s15, 4  ;;  %s160_s16 = int_to_ptr.vmem [resolvable:$true] %s159_s16 }
   0x8   :  { %v249_v14 = vpack.c.bf16 %v19_v13, %v18_v12  ;;  %v21_v16 = vld [vmem:[%s404_s1 + $0x48] sm:$0xff]  ;;  %v22_v18 = vld [vmem:[%s404_s1 + $0x50] sm:$0xff]  ;;  %v23_v19 = vld [vmem:[%s404_s1 + $0x58] sm:$0xff]  ;;  %s273_s17 = scalar_lea.vmem %s160_s16, 16  ;;  %p278_p1 = scmp.lt.s32.totalorder %s160_s16, %s160_s16 }
   0x9   :  { %v253_v17 = vpack.c.bf16 %v21_v16, %v20_v15  ;;  %v257_v20 = vpack.c.bf16 %v23_v19, %v22_v18  ;;  %v24_v21 = vld [vmem:[%s404_s1 + $0x60] sm:$0xff]  ;;  %v25_v22 = vld [vmem:[%s404_s1 + $0x68] sm:$0xff]  ;;  %v26_v24 = vld [vmem:[%s404_s1 + $0x70] sm:$0xff]  ;;  %p274_p0 = scmp.ne.s32.totalorder %s160_s16, %s273_s17 }
   0xa   :  { %v261_v23 = vpack.c.bf16 %v25_v22, %v24_v21  ;;  %v27_v25 = vld [vmem:[%s404_s1 + $0x78] sm:$0xff]  ;;  %v150_v28 = vld [vmem:[%s403_s0] sm:$0x1]  ;;  %s277_s1 = scalar_lea.vmem %s160_s16, 32 }
   0xb   :  { %v265_v26 = vpack.c.bf16 %v27_v25, %v26_v24  ;;  %p279_p2 = scmp.lt.s32.totalorder %s277_s1, %s273_s17 }
   0xc   :  { %243 = vmatpush3.bf16.xpose.msk.msra.mxu0 %vm325_vm1, %v241_v8 }
   0xd   :  { %244 = vmatprep.subr.bf16.mxu0 %v297_v2  ;;  %p280_p3 = por %p279_p2, %p278_p1 }
   0xf   :  { %p281_p4 = pnand %p280_p3, %p274_p0 }
  0x14   :  { %247 = vmatpush3.bf16.xpose.msk.msra.mxu0 %vm325_vm1, %v245_v11 }
  0x15   :  { %248 = vmatprep.subr.bf16.mxu0 %v297_v2 }
  0x1c   :  { %251 = vmatpush3.bf16.xpose.msk.msra.mxu0 %vm325_vm1, %v249_v14 }
  0x1d   :  { %252 = vmatprep.subr.bf16.mxu0 %v297_v2 }
  0x24   :  { %255 = vmatpush3.bf16.xpose.msk.msra.mxu0 %vm325_vm1, %v253_v17 }
  0x25   :  { %256 = vmatprep.subr.bf16.mxu0 %v297_v2 }
  0x2c   :  { %259 = vmatpush3.bf16.xpose.msk.msra.mxu0 %vm325_vm1, %v257_v20 }
  0x2d   :  { %260 = vmatprep.subr.bf16.mxu0 %v297_v2 }
  0x34   :  { %263 = vmatpush3.bf16.xpose.msk.msra.mxu0 %vm325_vm1, %v261_v23 }
  0x35   :  { %264 = vmatprep.subr.bf16.mxu0 %v297_v2 }
  0x3c   :  { %267 = vmatpush3.bf16.xpose.msk.msra.mxu0 %vm325_vm1, %v265_v26 }
  0x43   :  { %234 = vmatmul.mubr.msk.f32.vlgmr.msra.gmra.mrb[0].mxu0 %vm28_vm0, %v300_v27 }
 0x116   :  { %v146_v29 = vpop.f32.mrb[0].mxu0 }
 0x117   :  { %v151_v30 = vmul.f32 %v150_v28, %v146_v29  ;;  %v235_v31 = vpop.f32.mrb[1].mxu0 }
 0x119   :  { %152 = vst [vmem:[#allocation2] sm:$0x1] %v151_v30 }
 0x11a   :  { %284 = shalt.err (!%p281_p4)
}
 0x11b   :  { %s285_s20 = scalar_lea.hbm %s405_s2, 16 }
 0x11c   :  { %p286_p5 = scmp.ne.s32.totalorder %s405_s2, %s285_s20  ;;  %p289_p6 = scmp.lt.u32.totalorder %s285_s20, %s405_s2 }
 0x11e   :  { %p291_p7 = pnand %p289_p6, %p286_p5 }
 0x120   :  { %294 = shalt.err (!%p291_p7)
}
 0x121   :  { %162 = dma.vmem_to_hbm [thread:$0]  %s160_s16, 16, %s405_s2, [#allocation3]  }
 0x122   :  { %295 = dma.done.wait [#allocation3], 16  }
 0x123   :  { %296 = vsyncadd [#allocation3], 4294967280 }
 0x124   :  { %166 = vsyncpa [#allocation3], 1 }

// kernel: tpu_custom_call.1
= control target key start
LH: loop header
LB: loop body
LE: loop exit
PB: predicated region body
PF: predicated region fallthrough
CT: control target
= control target key end

     0   :  { %vm28_vm0 = vcmask 261120   ;;  %v297_v2 = vmov 0.0|0.0   ;;  %vm298_vm2 = vmmov 0   ;;  %v299_v5 = vmov 0.0   ;;  %s403_s0 = inlined_call_operand.vmem [shape: f32[1,128], index: 0, kind: input, shape index: {}]   ;;  %s404_s1 = inlined_call_operand.vmem [shape: f32[128,32], index: 1, kind: input, shape index: {}]   ;;  %s405_s2 = inlined_call_operand.hbm [shape: f32[1,128], index: 2, kind: output, shape index: {}]  }
   0x1   :  { %v12_v0 = vld [vmem:[%s404_s1] sm:$0xff]  ;;  %v13_v1 = vld [vmem:[%s404_s1 + $0x8] sm:$0xff]  ;;  %236 = vmatprep.subr.bf16.mxu0 %v297_v2  ;;  %vm325_vm1 = vmpackc.low %vm28_vm0, %vm28_vm0  ;;  %233 = vmatprep.mubr.msk.f32.mxu0 %vm298_vm2, %v299_v5 }
   0x2   :  { %v237_v3 = vpack.c.bf16 %v13_v1, %v12_v0  ;;  %v14_v6 = vld [vmem:[%s404_s1 + $0x10] sm:$0xff]  ;;  %v15_v7 = vld [vmem:[%s404_s1 + $0x18] sm:$0xff] }
   0x4   :  { %239 = vmatpush3.bf16.xpose.msk.msra.mxu0 %vm325_vm1, %v237_v3 }
   0x5   :  { %240 = vmatprep.subr.bf16.mxu0 %v297_v2 }
   0x6   :  { %7 = vsyncpa [#allocation3], 0  ;;  %v241_v8 = vpack.c.bf16 %v15_v7, %v14_v6  ;;  %v16_v9 = vld [vmem:[%s404_s1 + $0x20] sm:$0xff]  ;;  %v17_v10 = vld [vmem:[%s404_s1 + $0x28] sm:$0xff]  ;;  %v300_v27 = vmov 1.0   ;;  %s301_s15 = smov [#allocation2]  }
   0x7   :  { %v245_v11 = vpack.c.bf16 %v17_v10, %v16_v9  ;;  %v18_v12 = vld [vmem:[%s404_s1 + $0x30] sm:$0xff]  ;;  %v19_v13 = vld [vmem:[%s404_s1 + $0x38] sm:$0xff]  ;;  %v20_v15 = vld [vmem:[%s404_s1 + $0x40] sm:$0xff]  ;;  %s159_s16 = sshll.u32 %s301_s15, 4  ;;  %s160_s16 = int_to_ptr.vmem [resolvable:$true] %s159_s16 }
   0x8   :  { %v249_v14 = vpack.c.bf16 %v19_v13, %v18_v12  ;;  %v21_v16 = vld [vmem:[%s404_s1 + $0x48] sm:$0xff]  ;;  %v22_v18 = vld [vmem:[%s404_s1 + $0x50] sm:$0xff]  ;;  %v23_v19 = vld [vmem:[%s404_s1 + $0x58] sm:$0xff]  ;;  %s273_s17 = scalar_lea.vmem %s160_s16, 16  ;;  %p278_p1 = scmp.lt.s32.totalorder %s160_s16, %s160_s16 }
   0x9   :  { %v253_v17 = vpack.c.bf16 %v21_v16, %v20_v15  ;;  %v257_v20 = vpack.c.bf16 %v23_v19, %v22_v18  ;;  %v24_v21 = vld [vmem:[%s404_s1 + $0x60] sm:$0xff]  ;;  %v25_v22 = vld [vmem:[%s404_s1 + $0x68] sm:$0xff]  ;;  %v26_v24 = vld [vmem:[%s404_s1 + $0x70] sm:$0xff]  ;;  %p274_p0 = scmp.ne.s32.totalorder %s160_s16, %s273_s17 }
   0xa   :  { %v261_v23 = vpack.c.bf16 %v25_v22, %v24_v21  ;;  %v27_v25 = vld [vmem:[%s404_s1 + $0x78] sm:$0xff]  ;;  %v150_v28 = vld [vmem:[%s403_s0] sm:$0x1]  ;;  %s277_s1 = scalar_lea.vmem %s160_s16, 32 }
   0xb   :  { %v265_v26 = vpack.c.bf16 %v27_v25, %v26_v24  ;;  %p279_p2 = scmp.lt.s32.totalorder %s277_s1, %s273_s17 }
   0xc   :  { %243 = vmatpush3.bf16.xpose.msk.msra.mxu0 %vm325_vm1, %v241_v8 }
   0xd   :  { %244 = vmatprep.subr.bf16.mxu0 %v297_v2  ;;  %p280_p3 = por %p279_p2, %p278_p1 }
   0xf   :  { %p281_p4 = pnand %p280_p3, %p274_p0 }
  0x14   :  { %247 = vmatpush3.bf16.xpose.msk.msra.mxu0 %vm325_vm1, %v245_v11 }
  0x15   :  { %248 = vmatprep.subr.bf16.mxu0 %v297_v2 }
  0x1c   :  { %251 = vmatpush3.bf16.xpose.msk.msra.mxu0 %vm325_vm1, %v249_v14 }
  0x1d   :  { %252 = vmatprep.subr.bf16.mxu0 %v297_v2 }
  0x24   :  { %255 = vmatpush3.bf16.xpose.msk.msra.mxu0 %vm325_vm1, %v253_v17 }
  0x25   :  { %256 = vmatprep.subr.bf16.mxu0 %v297_v2 }
  0x2c   :  { %259 = vmatpush3.bf16.xpose.msk.msra.mxu0 %vm325_vm1, %v257_v20 }
  0x2d   :  { %260 = vmatprep.subr.bf16.mxu0 %v297_v2 }
  0x34   :  { %263 = vmatpush3.bf16.xpose.msk.msra.mxu0 %vm325_vm1, %v261_v23 }
  0x35   :  { %264 = vmatprep.subr.bf16.mxu0 %v297_v2 }
  0x3c   :  { %267 = vmatpush3.bf16.xpose.msk.msra.mxu0 %vm325_vm1, %v265_v26 }
  0x43   :  { %234 = vmatmul.mubr.msk.f32.vlgmr.msra.gmra.mrb[0].mxu0 %vm28_vm0, %v300_v27 }
 0x116   :  { %v146_v29 = vpop.f32.mrb[0].mxu0 }
 0x117   :  { %v151_v30 = vmul.f32 %v150_v28, %v146_v29  ;;  %v235_v31 = vpop.f32.mrb[1].mxu0 }
 0x119   :  { %152 = vst [vmem:[#allocation2] sm:$0x1] %v151_v30 }
 0x11a   :  { %284 = shalt.err (!%p281_p4)
}
 0x11b   :  { %s285_s20 = scalar_lea.hbm %s405_s2, 16 }
 0x11c   :  { %p286_p5 = scmp.ne.s32.totalorder %s405_s2, %s285_s20  ;;  %p289_p6 = scmp.lt.u32.totalorder %s285_s20, %s405_s2 }
 0x11e   :  { %p291_p7 = pnand %p289_p6, %p286_p5 }
 0x120   :  { %294 = shalt.err (!%p291_p7)
}
 0x121   :  { %162 = dma.vmem_to_hbm [thread:$0]  %s160_s16, 16, %s405_s2, [#allocation3]  }
 0x122   :  { %295 = dma.done.wait [#allocation3], 16  }
 0x123   :  { %296 = vsyncadd [#allocation3], 4294967280 }
 0x124   :  { %166 = vsyncpa [#allocation3], 1 }

</bundles_post_ra>
